<compile_context>
chip_gen: v7x
topology: tpu7x:2x2x1
jax: 0.10.0
libtpu: 0.0.40
codegen_flags: <defaults>
</compile_context>

<pallas_src>
import functools

import jax
import jax.numpy as jnp
from jax.experimental import pallas as pl
from jax.experimental.pallas import tpu as pltpu

NUM_CAPSULES = 2       # number of output ("digit") capsules
IN_DIM = 8             # dimension of each input capsule vector
OUT_DIM = 16           # dimension of each output capsule vector
ROUTING_ITERS = 3      # dynamic routing iterations


def digitcaps_kernel(u_ref, w_ref, v_ref, *, nc, od, iters):
    # u_ref: [TB, ID, IC]      (TB batch elements; IC on the lane axis)
    # w_ref: [ID, NC*OD, IC]   (W[i, j, d, k] stored at w_ref[k, j*OD + d, i])
    # v_ref: [TB, OD, NC]      (transposed output; wrapper swaps back to [TB, NC, OD])
    tb, idim, ic = u_ref.shape
    ncod = w_ref.shape[1]

    u = u_ref[...].astype(jnp.float32)                          # [TB, ID, IC]

    # u_hat[b, j*OD+d, i] = sum_k W[i,j,d,k] * u[b,i,k]
    # K = ID = 8: unrolled full-lane VPU FMAs (deliberately NOT MXU work).
    # u[:, k:k+1, :] is a cheap sublane broadcast; w_ref[k] is read per-k to keep
    # vreg pressure low (full W stays resident in VMEM).
    u_hat = jnp.zeros((tb, ncod, ic), dtype=jnp.float32)
    for k in range(idim):
        u_hat = u_hat + w_ref[k].astype(jnp.float32) * u[:, k:k + 1, :]

    # Per-output-capsule views (static, sublane-aligned slices): [TB, OD, IC] each.
    uh = [u_hat[:, j * od:(j + 1) * od, :] for j in range(nc)]

    inv_nc = jnp.float32(1.0 / nc)
    b_cols = None                                   # routing logits, nc x [TB, 1, IC]

    for it in range(iters):
        last = (it == iters - 1)

        if it == 0:
            c_cols = None                           # b == 0 -> softmax is exactly 1/NC
        else:
            # softmax over the output-capsule axis (dim=2 in the PyTorch code),
            # done on full-lane [TB, 1, IC] vectors.
            m = b_cols[0]
            for j in range(1, nc):
                m = jnp.maximum(m, b_cols[j])
            exps = [jnp.exp(bj - m) for bj in b_cols]
            denom = exps[0]
            for j in range(1, nc):
                denom = denom + exps[j]
            # exact reciprocal (approx=True would be free on the EUP, but exact is
            # kept so the rtol=1e-4 / atol=1e-5 check against the reference holds).
            inv_denom = pl.reciprocal(denom, approx=False)
            c_cols = [e * inv_denom for e in exps]  # [TB, 1, IC] each

        a_cols = []
        for j in range(nc):
            if it == 0:
                s_j = jnp.sum(uh[j], axis=-1, keepdims=True) * inv_nc      # [TB, OD, 1]
            else:
                s_j = jnp.sum(c_cols[j] * uh[j], axis=-1, keepdims=True)   # [TB, OD, 1]
            # squash (fused):  v = s * sq * rsqrt(sq + 1e-9) / (1 + sq)
            sq = jnp.sum(s_j * s_j, axis=1, keepdims=True)                 # [TB, 1, 1]
            scale = sq * jax.lax.rsqrt(sq + 1e-9) / (1.0 + sq)
            v_j = s_j * scale                                              # [TB, OD, 1]
            if last:
                v_ref[:, :, j:j + 1] = v_j.astype(v_ref.dtype)
            else:
                # agreement a_ij = <u_hat_ij, v_j>  (sublane reduce over OD)
                a_cols.append(jnp.sum(uh[j] * v_j, axis=1, keepdims=True))  # [TB, 1, IC]

        if not last:
            b_cols = a_cols if b_cols is None else [b_cols[j] + a_cols[j]
                                                    for j in range(nc)]


def _choose_batch_tile(batch):
    # Amortize the per-grid-step overhead, but keep at least 2 grid steps so the
    # ("parallel",) batch axis can be sharded across v7x's two TensorCores.
    if batch >= 16:
        return 8
    return max(1, batch // 2)


def digit_caps(u, W, *, routing_iterations=ROUTING_ITERS):
    """u: [B, IC, ID] float32;  W: [IC, NC, OD, ID] float32 -> v: [B, NC, OD]."""
    B, IC, ID = u.shape
    ICw, NC, OD, IDw = W.shape
    assert ICw == IC and IDw == ID

    # Lane-major repack (plain JAX, done once):
    #   u -> [B, ID, IC]   ;   W[i,j,d,k] -> w_packed[k, j*OD+d, i]  ([ID, NC*OD, IC])
    u_t = jnp.transpose(u, (0, 2, 1))
    w_packed = jnp.transpose(W, (3, 1, 2, 0)).reshape(ID, NC * OD, IC)

    TB = _choose_batch_tile(B)
    B_pad = pl.cdiv(B, TB) * TB
    if B_pad != B:
        u_t = jnp.pad(u_t, ((0, B_pad - B), (0, 0), (0, 0)))

    kernel = functools.partial(digitcaps_kernel, nc=NC, od=OD,
                               iters=routing_iterations)

    v_t = pl.pallas_call(
        kernel,
        out_shape=jax.ShapeDtypeStruct((B_pad, OD, NC), u.dtype),
        grid=(B_pad // TB,),
        in_specs=[
            pl.BlockSpec((TB, ID, IC), lambda b: (b, 0, 0)),
            pl.BlockSpec((ID, NC * OD, IC), lambda b: (0, 0, 0)),  # resident weights
        ],
        out_specs=pl.BlockSpec((TB, OD, NC), lambda b: (b, 0, 0)),
        compiler_params=pltpu.CompilerParams(
            dimension_semantics=("parallel",)),
    )(u_t, w_packed)

    # [B, OD, NC] -> [B, NC, OD]   (tiny layout plumbing outside the kernel)
    return jnp.transpose(v_t[:B], (0, 2, 1))


def digit_caps_reference(u, W, iters=ROUTING_ITERS):
    """Pure-JAX transcription of the PyTorch forward, for verification."""
    u_hat = jnp.einsum('ijdk,bik->bijd', W, u)               # [B, IC, NC, OD]
    B, IC, NC, OD = u_hat.shape
    b_ij = jnp.zeros((B, IC, NC, 1), dtype=u_hat.dtype)
    v_j = None
    for it in range(iters):
        c_ij = jax.nn.softmax(b_ij, axis=2)
        s_j = jnp.sum(c_ij * u_hat, axis=1, keepdims=True)   # [B, 1, NC, OD]
        sq = jnp.sum(s_j ** 2, axis=-1, keepdims=True)
        v_j = (sq / (1.0 + sq)) * s_j / jnp.sqrt(sq + 1e-9)
        if it < iters - 1:
            b_ij = b_ij + jnp.sum(u_hat * v_j, axis=-1, keepdims=True)
    return jnp.squeeze(v_j, axis=1)                          # [B, NC, OD]


if __name__ == "__main__":
    key = jax.random.PRNGKey(0)
    ku, kw = jax.random.split(key)

    B, IC = 2, 128   # batch, in_capsules (in_capsules is set dynamically in the module)
    u = jax.random.normal(ku, (B, IC, IN_DIM), dtype=jnp.float32)
    # TODO(synk): the PyTorch module lazily creates W = torch.randn(...) on first
    # forward; here W is an explicit deterministic input with the same shape.
    W = jax.random.normal(kw, (IC, NUM_CAPSULES, OUT_DIM, IN_DIM), dtype=jnp.float32)

    v = digit_caps(u, W)
    v = jax.block_until_ready(v)

    v_ref = digit_caps_reference(u, W)
    assert v.shape == (B, NUM_CAPSULES, OUT_DIM)
    assert jnp.allclose(v, v_ref, rtol=1e-4, atol=1e-5), "Pallas output mismatch vs reference"

    print("KERNEL_OK")
</pallas_src>

<mosaic_0001>
module attributes {stable_mosaic.version = 11 : i64} {
  func.func @digitcaps_kernel(%arg0: i32, %arg1: memref<1x8x128xf32, #tpu.memory_space<vmem>>, %arg2: memref<8x32x128xf32, #tpu.memory_space<vmem>>, %arg3: memref<1x16x2xf32, #tpu.memory_space<vmem>>) attributes {dimension_semantics = [#tpu.dimension_semantics<parallel>], iteration_bounds = array<i64: 2>, scalar_prefetch = 0 : i64, scratch_operands = 0 : i64, tpu.core_type = #tpu.core_type<tc>, window_params = [{transform_indices = @transform_0, window_bounds = array<i64: 1, 8, 128>}, {pipeline_mode = #tpu.pipeline_mode<synchronous>, transform_indices = @transform_1, window_bounds = array<i64: 8, 32, 128>}, {transform_indices = @transform_2, window_bounds = array<i64: 1, 16, 2>}]} {
    %c0 = arith.constant 0 : index
    %c0_0 = arith.constant 0 : index
    %c0_1 = arith.constant 0 : index
    %0 = vector.load %arg1[%c0, %c0_0, %c0_1] : memref<1x8x128xf32, #tpu.memory_space<vmem>>, vector<1x8x128xf32>
    %cst = arith.constant 0.000000e+00 : f32
    %1 = vector.broadcast %cst : f32 to vector<1x32x128xf32>
    %c0_2 = arith.constant 0 : index
    %c0_3 = arith.constant 0 : index
    %c0_4 = arith.constant 0 : index
    %2 = vector.load %arg2[%c0_2, %c0_3, %c0_4] : memref<8x32x128xf32, #tpu.memory_space<vmem>>, vector<1x32x128xf32>
    %3 = vector.shape_cast %2 : vector<1x32x128xf32> to vector<32x128xf32>
    %4 = vector.extract_strided_slice %0 {offsets = [0, 0, 0], sizes = [1, 1, 128], strides = [1, 1, 1]} : vector<1x8x128xf32> to vector<1x1x128xf32>
    %5 = vector.shape_cast %3 : vector<32x128xf32> to vector<1x32x128xf32>
    %6 = vector.broadcast %4 : vector<1x1x128xf32> to vector<1x32x128xf32>
    %7 = arith.mulf %5, %6 : vector<1x32x128xf32>
    %8 = arith.addf %1, %7 : vector<1x32x128xf32>
    %c1 = arith.constant 1 : index
    %c0_5 = arith.constant 0 : index
    %c0_6 = arith.constant 0 : index
    %9 = vector.load %arg2[%c1, %c0_5, %c0_6] : memref<8x32x128xf32, #tpu.memory_space<vmem>>, vector<1x32x128xf32>
    %10 = vector.shape_cast %9 : vector<1x32x128xf32> to vector<32x128xf32>
    %11 = vector.extract_strided_slice %0 {offsets = [0, 1, 0], sizes = [1, 1, 128], strides = [1, 1, 1]} : vector<1x8x128xf32> to vector<1x1x128xf32>
    %12 = vector.shape_cast %10 : vector<32x128xf32> to vector<1x32x128xf32>
    %13 = vector.broadcast %11 : vector<1x1x128xf32> to vector<1x32x128xf32>
    %14 = arith.mulf %12, %13 : vector<1x32x128xf32>
    %15 = arith.addf %8, %14 : vector<1x32x128xf32>
    %c2 = arith.constant 2 : index
    %c0_7 = arith.constant 0 : index
    %c0_8 = arith.constant 0 : index
    %16 = vector.load %arg2[%c2, %c0_7, %c0_8] : memref<8x32x128xf32, #tpu.memory_space<vmem>>, vector<1x32x128xf32>
    %17 = vector.shape_cast %16 : vector<1x32x128xf32> to vector<32x128xf32>
    %18 = vector.extract_strided_slice %0 {offsets = [0, 2, 0], sizes = [1, 1, 128], strides = [1, 1, 1]} : vector<1x8x128xf32> to vector<1x1x128xf32>
    %19 = vector.shape_cast %17 : vector<32x128xf32> to vector<1x32x128xf32>
    %20 = vector.broadcast %18 : vector<1x1x128xf32> to vector<1x32x128xf32>
    %21 = arith.mulf %19, %20 : vector<1x32x128xf32>
    %22 = arith.addf %15, %21 : vector<1x32x128xf32>
    %c3 = arith.constant 3 : index
    %c0_9 = arith.constant 0 : index
    %c0_10 = arith.constant 0 : index
    %23 = vector.load %arg2[%c3, %c0_9, %c0_10] : memref<8x32x128xf32, #tpu.memory_space<vmem>>, vector<1x32x128xf32>
    %24 = vector.shape_cast %23 : vector<1x32x128xf32> to vector<32x128xf32>
    %25 = vector.extract_strided_slice %0 {offsets = [0, 3, 0], sizes = [1, 1, 128], strides = [1, 1, 1]} : vector<1x8x128xf32> to vector<1x1x128xf32>
    %26 = vector.shape_cast %24 : vector<32x128xf32> to vector<1x32x128xf32>
    %27 = vector.broadcast %25 : vector<1x1x128xf32> to vector<1x32x128xf32>
    %28 = arith.mulf %26, %27 : vector<1x32x128xf32>
    %29 = arith.addf %22, %28 : vector<1x32x128xf32>
    %c4 = arith.constant 4 : index
    %c0_11 = arith.constant 0 : index
    %c0_12 = arith.constant 0 : index
    %30 = vector.load %arg2[%c4, %c0_11, %c0_12] : memref<8x32x128xf32, #tpu.memory_space<vmem>>, vector<1x32x128xf32>
    %31 = vector.shape_cast %30 : vector<1x32x128xf32> to vector<32x128xf32>
    %32 = vector.extract_strided_slice %0 {offsets = [0, 4, 0], sizes = [1, 1, 128], strides = [1, 1, 1]} : vector<1x8x128xf32> to vector<1x1x128xf32>
    %33 = vector.shape_cast %31 : vector<32x128xf32> to vector<1x32x128xf32>
    %34 = vector.broadcast %32 : vector<1x1x128xf32> to vector<1x32x128xf32>
    %35 = arith.mulf %33, %34 : vector<1x32x128xf32>
    %36 = arith.addf %29, %35 : vector<1x32x128xf32>
    %c5 = arith.constant 5 : index
    %c0_13 = arith.constant 0 : index
    %c0_14 = arith.constant 0 : index
    %37 = vector.load %arg2[%c5, %c0_13, %c0_14] : memref<8x32x128xf32, #tpu.memory_space<vmem>>, vector<1x32x128xf32>
    %38 = vector.shape_cast %37 : vector<1x32x128xf32> to vector<32x128xf32>
    %39 = vector.extract_strided_slice %0 {offsets = [0, 5, 0], sizes = [1, 1, 128], strides = [1, 1, 1]} : vector<1x8x128xf32> to vector<1x1x128xf32>
    %40 = vector.shape_cast %38 : vector<32x128xf32> to vector<1x32x128xf32>
    %41 = vector.broadcast %39 : vector<1x1x128xf32> to vector<1x32x128xf32>
    %42 = arith.mulf %40, %41 : vector<1x32x128xf32>
    %43 = arith.addf %36, %42 : vector<1x32x128xf32>
    %c6 = arith.constant 6 : index
    %c0_15 = arith.constant 0 : index
    %c0_16 = arith.constant 0 : index
    %44 = vector.load %arg2[%c6, %c0_15, %c0_16] : memref<8x32x128xf32, #tpu.memory_space<vmem>>, vector<1x32x128xf32>
    %45 = vector.shape_cast %44 : vector<1x32x128xf32> to vector<32x128xf32>
    %46 = vector.extract_strided_slice %0 {offsets = [0, 6, 0], sizes = [1, 1, 128], strides = [1, 1, 1]} : vector<1x8x128xf32> to vector<1x1x128xf32>
    %47 = vector.shape_cast %45 : vector<32x128xf32> to vector<1x32x128xf32>
    %48 = vector.broadcast %46 : vector<1x1x128xf32> to vector<1x32x128xf32>
    %49 = arith.mulf %47, %48 : vector<1x32x128xf32>
    %50 = arith.addf %43, %49 : vector<1x32x128xf32>
    %c7 = arith.constant 7 : index
    %c0_17 = arith.constant 0 : index
    %c0_18 = arith.constant 0 : index
    %51 = vector.load %arg2[%c7, %c0_17, %c0_18] : memref<8x32x128xf32, #tpu.memory_space<vmem>>, vector<1x32x128xf32>
    %52 = vector.shape_cast %51 : vector<1x32x128xf32> to vector<32x128xf32>
    %53 = vector.extract_strided_slice %0 {offsets = [0, 7, 0], sizes = [1, 1, 128], strides = [1, 1, 1]} : vector<1x8x128xf32> to vector<1x1x128xf32>
    %54 = vector.shape_cast %52 : vector<32x128xf32> to vector<1x32x128xf32>
    %55 = vector.broadcast %53 : vector<1x1x128xf32> to vector<1x32x128xf32>
    %56 = arith.mulf %54, %55 : vector<1x32x128xf32>
    %57 = arith.addf %50, %56 : vector<1x32x128xf32>
    %58 = vector.extract_strided_slice %57 {offsets = [0, 0, 0], sizes = [1, 16, 128], strides = [1, 1, 1]} : vector<1x32x128xf32> to vector<1x16x128xf32>
    %59 = vector.extract_strided_slice %57 {offsets = [0, 16, 0], sizes = [1, 16, 128], strides = [1, 1, 1]} : vector<1x32x128xf32> to vector<1x16x128xf32>
    %cst_19 = arith.constant dense<0.000000e+00> : vector<1x16xf32>
    %60 = vector.multi_reduction <add>, %58, %cst_19 [2] : vector<1x16x128xf32> to vector<1x16xf32>
    %61 = vector.shape_cast %60 : vector<1x16xf32> to vector<1x16x1xf32>
    %cst_20 = arith.constant 5.000000e-01 : f32
    %62 = vector.broadcast %cst_20 : f32 to vector<1x16x1xf32>
    %63 = arith.mulf %61, %62 : vector<1x16x1xf32>
    %64 = arith.mulf %63, %63 : vector<1x16x1xf32>
    %cst_21 = arith.constant dense<0.000000e+00> : vector<1x1xf32>
    %65 = vector.multi_reduction <add>, %64, %cst_21 [1] : vector<1x16x1xf32> to vector<1x1xf32>
    %66 = vector.shape_cast %65 : vector<1x1xf32> to vector<1x1x1xf32>
    %cst_22 = arith.constant 9.99999971E-10 : f32
    %67 = vector.broadcast %cst_22 : f32 to vector<1x1x1xf32>
    %68 = arith.addf %66, %67 : vector<1x1x1xf32>
    %69 = math.rsqrt %68 : vector<1x1x1xf32>
    %70 = arith.mulf %66, %69 : vector<1x1x1xf32>
    %cst_23 = arith.constant 1.000000e+00 : f32
    %71 = vector.broadcast %cst_23 : f32 to vector<1x1x1xf32>
    %72 = arith.addf %71, %66 : vector<1x1x1xf32>
    %73 = arith.divf %70, %72 : vector<1x1x1xf32>
    %74 = vector.broadcast %73 : vector<1x1x1xf32> to vector<1x16x1xf32>
    %75 = arith.mulf %63, %74 : vector<1x16x1xf32>
    %76 = vector.broadcast %75 : vector<1x16x1xf32> to vector<1x16x128xf32>
    %77 = arith.mulf %58, %76 : vector<1x16x128xf32>
    %cst_24 = arith.constant dense<0.000000e+00> : vector<1x128xf32>
    %78 = vector.multi_reduction <add>, %77, %cst_24 [1] : vector<1x16x128xf32> to vector<1x128xf32>
    %79 = vector.shape_cast %78 : vector<1x128xf32> to vector<1x1x128xf32>
    %cst_25 = arith.constant dense<0.000000e+00> : vector<1x16xf32>
    %80 = vector.multi_reduction <add>, %59, %cst_25 [2] : vector<1x16x128xf32> to vector<1x16xf32>
    %81 = vector.shape_cast %80 : vector<1x16xf32> to vector<1x16x1xf32>
    %cst_26 = arith.constant 5.000000e-01 : f32
    %82 = vector.broadcast %cst_26 : f32 to vector<1x16x1xf32>
    %83 = arith.mulf %81, %82 : vector<1x16x1xf32>
    %84 = arith.mulf %83, %83 : vector<1x16x1xf32>
    %cst_27 = arith.constant dense<0.000000e+00> : vector<1x1xf32>
    %85 = vector.multi_reduction <add>, %84, %cst_27 [1] : vector<1x16x1xf32> to vector<1x1xf32>
    %86 = vector.shape_cast %85 : vector<1x1xf32> to vector<1x1x1xf32>
    %cst_28 = arith.constant 9.99999971E-10 : f32
    %87 = vector.broadcast %cst_28 : f32 to vector<1x1x1xf32>
    %88 = arith.addf %86, %87 : vector<1x1x1xf32>
    %89 = math.rsqrt %88 : vector<1x1x1xf32>
    %90 = arith.mulf %86, %89 : vector<1x1x1xf32>
    %cst_29 = arith.constant 1.000000e+00 : f32
    %91 = vector.broadcast %cst_29 : f32 to vector<1x1x1xf32>
    %92 = arith.addf %91, %86 : vector<1x1x1xf32>
    %93 = arith.divf %90, %92 : vector<1x1x1xf32>
    %94 = vector.broadcast %93 : vector<1x1x1xf32> to vector<1x16x1xf32>
    %95 = arith.mulf %83, %94 : vector<1x16x1xf32>
    %96 = vector.broadcast %95 : vector<1x16x1xf32> to vector<1x16x128xf32>
    %97 = arith.mulf %59, %96 : vector<1x16x128xf32>
    %cst_30 = arith.constant dense<0.000000e+00> : vector<1x128xf32>
    %98 = vector.multi_reduction <add>, %97, %cst_30 [1] : vector<1x16x128xf32> to vector<1x128xf32>
    %99 = vector.shape_cast %98 : vector<1x128xf32> to vector<1x1x128xf32>
    %100 = arith.maximumf %79, %99 : vector<1x1x128xf32>
    %101 = arith.subf %79, %100 : vector<1x1x128xf32>
    %102 = math.exp %101 : vector<1x1x128xf32>
    %103 = arith.subf %99, %100 : vector<1x1x128xf32>
    %104 = math.exp %103 : vector<1x1x128xf32>
    %105 = arith.addf %102, %104 : vector<1x1x128xf32>
    %106 = tpu.reciprocal %105 : vector<1x1x128xf32> -> vector<1x1x128xf32>
    %107 = arith.mulf %102, %106 : vector<1x1x128xf32>
    %108 = arith.mulf %104, %106 : vector<1x1x128xf32>
    %109 = vector.broadcast %107 : vector<1x1x128xf32> to vector<1x16x128xf32>
    %110 = arith.mulf %109, %58 : vector<1x16x128xf32>
    %cst_31 = arith.constant dense<0.000000e+00> : vector<1x16xf32>
    %111 = vector.multi_reduction <add>, %110, %cst_31 [2] : vector<1x16x128xf32> to vector<1x16xf32>
    %112 = vector.shape_cast %111 : vector<1x16xf32> to vector<1x16x1xf32>
    %113 = arith.mulf %112, %112 : vector<1x16x1xf32>
    %cst_32 = arith.constant dense<0.000000e+00> : vector<1x1xf32>
    %114 = vector.multi_reduction <add>, %113, %cst_32 [1] : vector<1x16x1xf32> to vector<1x1xf32>
    %115 = vector.shape_cast %114 : vector<1x1xf32> to vector<1x1x1xf32>
    %cst_33 = arith.constant 9.99999971E-10 : f32
    %116 = vector.broadcast %cst_33 : f32 to vector<1x1x1xf32>
    %117 = arith.addf %115, %116 : vector<1x1x1xf32>
    %118 = math.rsqrt %117 : vector<1x1x1xf32>
    %119 = arith.mulf %115, %118 : vector<1x1x1xf32>
    %cst_34 = arith.constant 1.000000e+00 : f32
    %120 = vector.broadcast %cst_34 : f32 to vector<1x1x1xf32>
    %121 = arith.addf %120, %115 : vector<1x1x1xf32>
    %122 = arith.divf %119, %121 : vector<1x1x1xf32>
    %123 = vector.broadcast %122 : vector<1x1x1xf32> to vector<1x16x1xf32>
    %124 = arith.mulf %112, %123 : vector<1x16x1xf32>
    %125 = vector.broadcast %124 : vector<1x16x1xf32> to vector<1x16x128xf32>
    %126 = arith.mulf %58, %125 : vector<1x16x128xf32>
    %cst_35 = arith.constant dense<0.000000e+00> : vector<1x128xf32>
    %127 = vector.multi_reduction <add>, %126, %cst_35 [1] : vector<1x16x128xf32> to vector<1x128xf32>
    %128 = vector.shape_cast %127 : vector<1x128xf32> to vector<1x1x128xf32>
    %129 = vector.broadcast %108 : vector<1x1x128xf32> to vector<1x16x128xf32>
    %130 = arith.mulf %129, %59 : vector<1x16x128xf32>
    %cst_36 = arith.constant dense<0.000000e+00> : vector<1x16xf32>
    %131 = vector.multi_reduction <add>, %130, %cst_36 [2] : vector<1x16x128xf32> to vector<1x16xf32>
    %132 = vector.shape_cast %131 : vector<1x16xf32> to vector<1x16x1xf32>
    %133 = arith.mulf %132, %132 : vector<1x16x1xf32>
    %cst_37 = arith.constant dense<0.000000e+00> : vector<1x1xf32>
    %134 = vector.multi_reduction <add>, %133, %cst_37 [1] : vector<1x16x1xf32> to vector<1x1xf32>
    %135 = vector.shape_cast %134 : vector<1x1xf32> to vector<1x1x1xf32>
    %cst_38 = arith.constant 9.99999971E-10 : f32
    %136 = vector.broadcast %cst_38 : f32 to vector<1x1x1xf32>
    %137 = arith.addf %135, %136 : vector<1x1x1xf32>
    %138 = math.rsqrt %137 : vector<1x1x1xf32>
    %139 = arith.mulf %135, %138 : vector<1x1x1xf32>
    %cst_39 = arith.constant 1.000000e+00 : f32
    %140 = vector.broadcast %cst_39 : f32 to vector<1x1x1xf32>
    %141 = arith.addf %140, %135 : vector<1x1x1xf32>
    %142 = arith.divf %139, %141 : vector<1x1x1xf32>
    %143 = vector.broadcast %142 : vector<1x1x1xf32> to vector<1x16x1xf32>
    %144 = arith.mulf %132, %143 : vector<1x16x1xf32>
    %145 = vector.broadcast %144 : vector<1x16x1xf32> to vector<1x16x128xf32>
    %146 = arith.mulf %59, %145 : vector<1x16x128xf32>
    %cst_40 = arith.constant dense<0.000000e+00> : vector<1x128xf32>
    %147 = vector.multi_reduction <add>, %146, %cst_40 [1] : vector<1x16x128xf32> to vector<1x128xf32>
    %148 = vector.shape_cast %147 : vector<1x128xf32> to vector<1x1x128xf32>
    %149 = arith.addf %79, %128 : vector<1x1x128xf32>
    %150 = arith.addf %99, %148 : vector<1x1x128xf32>
    %151 = arith.maximumf %149, %150 : vector<1x1x128xf32>
    %152 = arith.subf %149, %151 : vector<1x1x128xf32>
    %153 = math.exp %152 : vector<1x1x128xf32>
    %154 = arith.subf %150, %151 : vector<1x1x128xf32>
    %155 = math.exp %154 : vector<1x1x128xf32>
    %156 = arith.addf %153, %155 : vector<1x1x128xf32>
    %157 = tpu.reciprocal %156 : vector<1x1x128xf32> -> vector<1x1x128xf32>
    %158 = arith.mulf %153, %157 : vector<1x1x128xf32>
    %159 = arith.mulf %155, %157 : vector<1x1x128xf32>
    %160 = vector.broadcast %158 : vector<1x1x128xf32> to vector<1x16x128xf32>
    %161 = arith.mulf %160, %58 : vector<1x16x128xf32>
    %cst_41 = arith.constant dense<0.000000e+00> : vector<1x16xf32>
    %162 = vector.multi_reduction <add>, %161, %cst_41 [2] : vector<1x16x128xf32> to vector<1x16xf32>
    %163 = vector.shape_cast %162 : vector<1x16xf32> to vector<1x16x1xf32>
    %164 = arith.mulf %163, %163 : vector<1x16x1xf32>
    %cst_42 = arith.constant dense<0.000000e+00> : vector<1x1xf32>
    %165 = vector.multi_reduction <add>, %164, %cst_42 [1] : vector<1x16x1xf32> to vector<1x1xf32>
    %166 = vector.shape_cast %165 : vector<1x1xf32> to vector<1x1x1xf32>
    %cst_43 = arith.constant 9.99999971E-10 : f32
    %167 = vector.broadcast %cst_43 : f32 to vector<1x1x1xf32>
    %168 = arith.addf %166, %167 : vector<1x1x1xf32>
    %169 = math.rsqrt %168 : vector<1x1x1xf32>
    %170 = arith.mulf %166, %169 : vector<1x1x1xf32>
    %cst_44 = arith.constant 1.000000e+00 : f32
    %171 = vector.broadcast %cst_44 : f32 to vector<1x1x1xf32>
    %172 = arith.addf %171, %166 : vector<1x1x1xf32>
    %173 = arith.divf %170, %172 : vector<1x1x1xf32>
    %174 = vector.broadcast %173 : vector<1x1x1xf32> to vector<1x16x1xf32>
    %175 = arith.mulf %163, %174 : vector<1x16x1xf32>
    %c0_45 = arith.constant 0 : index
    %c0_46 = arith.constant 0 : index
    %c0_47 = arith.constant 0 : index
    %176 = vector.load %arg3[%c0_45, %c0_46, %c0_47] : memref<1x16x2xf32, #tpu.memory_space<vmem>>, vector<1x16x1xf32>
    tpu.vector_store %arg3[%c0_45, %c0_46, %c0_47], %175 {strides = array<i32>} : memref<1x16x2xf32, #tpu.memory_space<vmem>>, vector<1x16x1xf32>,
    %177 = vector.broadcast %159 : vector<1x1x128xf32> to vector<1x16x128xf32>
    %178 = arith.mulf %177, %59 : vector<1x16x128xf32>
    %cst_48 = arith.constant dense<0.000000e+00> : vector<1x16xf32>
    %179 = vector.multi_reduction <add>, %178, %cst_48 [2] : vector<1x16x128xf32> to vector<1x16xf32>
    %180 = vector.shape_cast %179 : vector<1x16xf32> to vector<1x16x1xf32>
    %181 = arith.mulf %180, %180 : vector<1x16x1xf32>
    %cst_49 = arith.constant dense<0.000000e+00> : vector<1x1xf32>
    %182 = vector.multi_reduction <add>, %181, %cst_49 [1] : vector<1x16x1xf32> to vector<1x1xf32>
    %183 = vector.shape_cast %182 : vector<1x1xf32> to vector<1x1x1xf32>
    %cst_50 = arith.constant 9.99999971E-10 : f32
    %184 = vector.broadcast %cst_50 : f32 to vector<1x1x1xf32>
    %185 = arith.addf %183, %184 : vector<1x1x1xf32>
    %186 = math.rsqrt %185 : vector<1x1x1xf32>
    %187 = arith.mulf %183, %186 : vector<1x1x1xf32>
    %cst_51 = arith.constant 1.000000e+00 : f32
    %188 = vector.broadcast %cst_51 : f32 to vector<1x1x1xf32>
    %189 = arith.addf %188, %183 : vector<1x1x1xf32>
    %190 = arith.divf %187, %189 : vector<1x1x1xf32>
    %191 = vector.broadcast %190 : vector<1x1x1xf32> to vector<1x16x1xf32>
    %192 = arith.mulf %180, %191 : vector<1x16x1xf32>
    %c0_52 = arith.constant 0 : index
    %c0_53 = arith.constant 0 : index
    %c1_54 = arith.constant 1 : index
    %193 = vector.load %arg3[%c0_52, %c0_53, %c1_54] : memref<1x16x2xf32, #tpu.memory_space<vmem>>, vector<1x16x1xf32>
    tpu.vector_store %arg3[%c0_52, %c0_53, %c1_54], %192 {strides = array<i32>} : memref<1x16x2xf32, #tpu.memory_space<vmem>>, vector<1x16x1xf32>,
    return
  }
  func.func @transform_0(%arg0: i32) -> (i32, i32, i32) {
    %c0_i32 = arith.constant 0 : i32
    %c0_i32_0 = arith.constant 0 : i32
    %c0_i32_1 = arith.constant 0 : i32
    return %arg0, %c0_i32, %c0_i32_0 : i32, i32, i32
  }
  func.func @transform_1(%arg0: i32) -> (i32, i32, i32) {
    %c0_i32 = arith.constant 0 : i32
    %c0_i32_0 = arith.constant 0 : i32
    %c0_i32_1 = arith.constant 0 : i32
    %c0_i32_2 = arith.constant 0 : i32
    return %c0_i32, %c0_i32_0, %c0_i32_1 : i32, i32, i32
  }
  func.func @transform_2(%arg0: i32) -> (i32, i32, i32) {
    %c0_i32 = arith.constant 0 : i32
    %c0_i32_0 = arith.constant 0 : i32
    %c0_i32_1 = arith.constant 0 : i32
    return %arg0, %c0_i32, %c0_i32_0 : i32, i32, i32
  }
}

</mosaic_0001>

<bundles_post_ra>
// kernel: tpu_custom_call.1
= control target key start
LH: loop header
LB: loop body
LE: loop exit
PB: predicated region body
PF: predicated region fallthrough
CT: control target
= control target key end

     0   :  { %7 = vsyncpa [#allocation3], 0  ;;  %s1007_s0 = inlined_call_operand.hbm [shape: f32[2,8,128], index: 0, kind: input, shape index: {}]   ;;  %s1008_s1 = inlined_call_operand.hbm [shape: f32[8,32,128], index: 1, kind: input, shape index: {}]   ;;  %s1009_s2 = inlined_call_operand.vmem [shape: f32[2,16,2], index: 2, kind: output, shape index: {}]  }
   0x1   :  { %9 = vsyncpa [#allocation3 + $0x1], 0 }
   0x2   :  { %10 = vsyncpa [#allocation5], 0  ;;  %s812_s9 = smov 0   ;;  %s814_s10 = smov 0  }
   0x3   :  { %s816_s11 = smov 0   ;;  %s818_s12 = smov 0  }
   0x4 LB: > { %s831_s13 = sadd.s32 4294967295, %s791_s12   ;;  %p36_p0 = scmp.ne.s32.totalorder %s783_s10, %s779_s9  ;;  %s791_s12 = sphi %s818_s12, %s1024_s12   ;;  %s787_s11 = sphi %s816_s11, %s1023_s11   ;;  %s783_s10 = sphi %s814_s10, %s1022_s10   ;;  %s779_s9 = sphi %s812_s9, %s1021_s9  }
   0x5   : > { %p1010_p1 = scmp.eq.s32.totalorder %s831_s13, 0  ;;  %p594_p2 = scmp.ge.s32.totalorder %s791_s12, 1 }
   0x6   : > { %p94_p3 = scmp.lt.s32.totalorder %s791_s12, 3  ;;  %s793_s16 = smov [#allocation4]  }
   0x7   : > { %p839_p4 = por %p1010_p1, %p36_p0  ;;  %s106_s17 = sshll.u32 %s793_s16, 4  ;;  %s107_s17 = int_to_ptr.vmem [resolvable:$true] %s106_s17 }
   0x8   : > { %p843_p5 = pnand %p594_p2, %p94_p3  ;;  %s856_s19 = sadd.s32 1, %s791_s12  }
   0x9   : > { %s1013_s14 = scalar_select %p839_p4, 1, 0 }
   0xa   : > { %s1014_s15 = scalar_select %p843_p5, 1, 0 }
   0xb   : > { %p613_p6 = pneg %p843_p5  ;;  %s23_s20 = sadd.s32 1, %s787_s11 }
   0xc   : > { %s20_s21 = ssub.s32 %s791_s12, %s856_s19  ;;  %s695_s24 = scalar_lea.hbm %s1008_s1, 4096 }
   0xd   : > { %p851_p7 = pnand %p613_p6, %p1010_p1  ;;  %p696_p8 = scmp.ne.s32.totalorder %s1008_s1, %s695_s24 }
   0xe   : > { %p702_p12 = scmp.lt.u32.totalorder %s695_s24, %s1008_s1 }
   0xf   : > { %p697_p9 = pneg %p851_p7 }
  0x11   : > { %p698_p10 = pnand %p697_p9, %p696_p8 }
  0x13   : > { %p699_p11 = pneg %p698_p10 }
  0x15   : > { %p704_p13 = pnand %p702_p12, %p699_p11 }
  0x17   : > { %707 = shalt.err (!%p704_p13)
}
  0x18   : > { %s708_s29 = scalar_lea.vmem %s107_s17, 4096  ;;  %p716_p6 = scmp.lt.s32.totalorder %s107_s17, %s107_s17 }
  0x19   : > { %p709_p0 = scmp.ne.s32.totalorder %s107_s17, %s708_s29  ;;  %p717_p1 = scmp.lt.s32.totalorder %s708_s29, %s708_s29 }
  0x1b   : > { %p711_p2 = pnand %p709_p0, %p697_p9  ;;  %p718_p4 = por %p717_p1, %p716_p6 }
  0x1d   : > { %p712_p3 = pneg %p711_p2 }
  0x1f   : > { %p719_p5 = pnand %p718_p4, %p712_p3 }
  0x21   : > { %722 = shalt.err (!%p719_p5)
}
  0x22   : > { %s794_s30 = smov 128   ;;  %s795_s3 = smov 8  }
  0x23   : > { %616 = dma.hbm_to_vmem [thread:$0]  (!%p851_p7), %s1008_s1, 4096, %s107_s17, [#allocation5], %s794_s30, %s794_s30, %s795_s3  }
  0x24   : > { %p21_p8 = scmp.eq.s32.totalorder %s20_s21, 0  ;;  %p30_p9 = scmp.ne.s32.totalorder %s787_s11, %s783_s10 }
  0x25   : > { %p31_p1 = scmp.eq.s32.totalorder %s791_s12, 0  ;;  %p622_p4 = scmp.lt.s32.totalorder %s791_s12, 2 }
  0x26   : > { %s882_s6 = scalar_select %p21_p8, %s787_s11, %s23_s20  }
  0x27   : > { %p32_p5 = por %p31_p1, %p30_p9  ;;  %s120_s7 = sand.u32 1, %s787_s11  }
  0x28   : > { %s597_s8 = sshll.u32 %s120_s7, 3  ;;  %s598_s9 = sshll.u32 %s791_s12, 7 }
  0x29   : > { %s889_s23 = scalar_lea.hbm %s1007_s0, %s598_s9  ;;  %s124_s17 = scalar_lea.vmem [#allocation2], %s597_s8 }
  0x2a   : > { %s131_s18 = sshll.u32 %s124_s17, 4  ;;  %p893_p7 = pnand %p622_p4, %p32_p5  ;;  %s891_s18 = int_to_ptr.vmem [resolvable:$true] %s131_s18 }
  0x2b   : > { %s121_s12 = scalar_lea.sflag [#allocation3], %s120_s7  ;;  %s723_s21 = scalar_lea.hbm %s889_s23, 128 }
  0x2c   : > { %p724_p10 = scmp.ne.s32.totalorder %s889_s23, %s723_s21  ;;  %p725_p11 = pneg %p893_p7 }
  0x2d   : > { %s728_s26 = scalar_lea.hbm %s1007_s0, 256  ;;  %p729_p0 = scmp.lt.u32.totalorder %s889_s23, %s1007_s0 }
  0x2e   : > { %p726_p12 = pnand %p725_p11, %p724_p10  ;;  %p730_p2 = scmp.lt.u32.totalorder %s728_s26, %s723_s21 }
  0x2f   : > { %p732_p6 = scmp.lt.u32.totalorder %s723_s21, %s889_s23 }
  0x30   : > { %p727_p13 = pneg %p726_p12  ;;  %p731_p3 = por %p730_p2, %p729_p0 }
  0x32   : > { %p733_p8 = por %p732_p6, %p731_p3 }
  0x34   : > { %p734_p9 = pnand %p733_p8, %p727_p13 }
  0x36   : > { %737 = shalt.err (!%p734_p9)
}
  0x37   : > { %s738_s29 = scalar_lea.vmem %s891_s18, 128  ;;  %s796_s30 = smov [#allocation2]  }
  0x38   : > { %p739_p1 = scmp.ne.s32.totalorder %s891_s18, %s738_s29  ;;  %s743_s3 = sshll.u32 %s796_s30, 4  ;;  %s744_s3 = int_to_ptr.vmem [resolvable:$false] %s743_s3 }
  0x39   : > { %s745_s4 = scalar_lea.vmem %s744_s3, 256  ;;  %p746_p10 = scmp.lt.s32.totalorder %s891_s18, %s744_s3 }
  0x3a   : > { %p741_p4 = pnand %p739_p1, %p725_p11  ;;  %p747_p12 = scmp.lt.s32.totalorder %s745_s4, %s738_s29 }
  0x3c   : > { %p742_p5 = pneg %p741_p4  ;;  %p748_p0 = por %p747_p12, %p746_p10 }
  0x3e   : > { %p749_p2 = pnand %p748_p0, %p742_p5 }
  0x40   : > { %752 = shalt.err (!%p749_p2)
}
  0x41   : > { %620 = dma.hbm_to_vmem [thread:$0]  (!%p893_p7), %s889_s23, 128, %s891_s18, %s121_s12  }
  0x42   : > { %p1017_p13 = scmp.ne.s32.totalorder %s1014_s15, 0 }
  0x43   : > { %s142_s5 = sand.u32 (!%p1017_p13), 1, %s783_s10   ;;  %p1018_p11 = scmp.ne.s32.totalorder (!%p1017_p13), %s1013_s14, 0 }
  0x44   : > { %140 = sbr.rel (%p1017_p13) target bundleno = 755 (0x2f3), region = 28  ;;  %s600_s7 = sshll.u32 (!%p1017_p13), %s142_s5, 3 }
  0x45   : > { %s143_s8 = scalar_lea.sflag (!%p1017_p13), [#allocation3], %s142_s5  ;;  %s146_s9 = scalar_lea.vmem (!%p1017_p13), [#allocation2], %s600_s7 }
  0x4b   : > { %770 = dma.done.wait (%p1018_p11), %s143_s8, 128  }
  0x4c   : > { %772 = vsyncadd (%p1018_p11), %s143_s8, 4294967168  ;;  %p1019_p3 = scmp.eq.s32.totalorder %s831_s13, 0 }
  0x4e   : > { %774 = dma.done.wait (%p1019_p3), [#allocation5], 4096   ;;  %p1020_p6 = pmov %p1019_p3 }
  0x4f   : > { %v181_v0 = vlaneseq  ;;  %v176_v7 = vld [vmem:[%s146_s9] sm:$0xff]  ;;  %v177_v23 = vld [vmem:[#allocation4] sm:$0xff]  ;;  %v178_v52 = vld [vmem:[#allocation4 + $0x8] sm:$0xff]  ;;  %p171_p7 = scmp.lt.s32.totalorder %s831_s13, 1  ;;  %vm487_vm0 = vcmask 7168   ;;  %vm513_vm1 = vcmask 15368  }
  0x50   : > { %776 = vsyncadd (%p1020_p6), [#allocation5], 4294963200  ;;  %v179_v8 = vld [vmem:[#allocation4 + $0x10] sm:$0xff]  ;;  %v194_v24 = vld [vmem:[#allocation4 + $0x20] sm:$0xff] }
  0x51   : > { %v182_v1 = vshrl.u32 %v181_v0, 7  ;;  %v196_v9 = vld [vmem:[#allocation4 + $0x30] sm:$0xff]  ;;  %v211_v25 = vld [vmem:[#allocation4 + $0x40] sm:$0xff]  ;;  %v180_v37 = vld [vmem:[#allocation4 + $0x18] sm:$0xff]  ;;  %s1026_s13 = smov (!%p171_p7, %s831_s13), 1 }
  0x52   : > { %v213_v14 = vld [vmem:[#allocation4 + $0x50] sm:$0xff]  ;;  %v228_v30 = vld [vmem:[#allocation4 + $0x60] sm:$0xff]  ;;  %v197_v40 = vld [vmem:[#allocation4 + $0x38] sm:$0xff]  ;;  %s606_s14 = sshll.u32 %s1026_s13, 4 }
  0x53   : > { %v183_v2 = vsub.s32 0, %v182_v1  ;;  %v200_v3 = vsub.s32 1, %v182_v1  ;;  %v217_v4 = vsub.s32 2, %v182_v1  ;;  %v234_v5 = vsub.s32 3, %v182_v1  ;;  %v230_v16 = vld [vmem:[#allocation4 + $0x70] sm:$0xff]  ;;  %v245_v39 = vld [vmem:[#allocation4 + $0x80] sm:$0xff]  ;;  %s175_s22 = scalar_lea.vmem %s1009_s2, %s606_s14 }
  0x54   : > { %v251_v6 = vsub.s32 4, %v182_v1  ;;  %v268_v10 = vsub.s32 5, %v182_v1  ;;  %v285_v11 = vsub.s32 6, %v182_v1  ;;  %v247_v18 = vld [vmem:[#allocation4 + $0x90] sm:$0xff]  ;;  %v302_v29 = vsub.s32 7, %v182_v1  ;;  %v214_v41 = vld [vmem:[#allocation4 + $0x58] sm:$0xff] }
  0x55   : > { %v184_v12 = vrot.slane %v176_v7, %v183_v2  ;;  %v201_v13 = vrot.slane %v176_v7, %v200_v3  ;;  %v218_v15 = vrot.slane %v176_v7, %v217_v4  ;;  %v235_v17 = vrot.slane %v176_v7, %v234_v5  ;;  %v264_v32 = vld [vmem:[#allocation4 + $0xb0] sm:$0xff]  ;;  %v231_v46 = vld [vmem:[#allocation4 + $0x78] sm:$0xff]  ;;  %v262_v49 = vld [vmem:[#allocation4 + $0xa0] sm:$0xff] }
  0x56   : > { %v933_v19 = vrot.slane %v176_v7, %v251_v6  ;;  %v935_v27 = vrot.slane %v176_v7, %v268_v10  ;;  %v937_v28 = vrot.slane %v176_v7, %v285_v11  ;;  %v281_v33 = vld [vmem:[#allocation4 + $0xd0] sm:$0xff]  ;;  %v303_v48 = vrot.slane %v176_v7, %v302_v29  ;;  %v195_v53 = vld [vmem:[#allocation4 + $0x28] sm:$0xff]  ;;  %v248_v58 = vld [vmem:[#allocation4 + $0x98] sm:$0xff] }
  0x57   : > { %v187_v20 = vmul.f32 %v184_v12, %v179_v8  ;;  %v204_v21 = vmul.f32 %v201_v13, %v196_v9  ;;  %v221_v22 = vmul.f32 %v218_v15, %v213_v14  ;;  %v238_v26 = vmul.f32 %v235_v17, %v230_v16  ;;  %v212_v59 = vld [vmem:[#allocation4 + $0x48] sm:$0xff]  ;;  %v298_v61 = vld [vmem:[#allocation4 + $0xf0] sm:$0xff]  ;;  %v279_v62 = vld [vmem:[#allocation4 + $0xc0] sm:$0xff] }
  0x58   : > { %v185_v34 = vmul.f32 %v184_v12, %v177_v23  ;;  %v202_v35 = vmul.f32 %v201_v13, %v194_v24  ;;  %v219_v36 = vmul.f32 %v218_v15, %v211_v25  ;;  %v255_v38 = vmul.f32 %v933_v19, %v247_v18  ;;  %v229_v60 = vld [vmem:[#allocation4 + $0x68] sm:$0xff]  ;;  %v265_v6 = vld [vmem:[#allocation4 + $0xb8] sm:$0xff]  ;;  %v296_v9 = vld [vmem:[#allocation4 + $0xe0] sm:$0xff] }
  0x59   : > { %v208_v31 = vadd.f32 %v204_v21, %v187_v20  ;;  %v236_v44 = vmul.f32 %v235_v17, %v228_v30  ;;  %v188_v45 = vmul.f32 %v184_v12, %v180_v37  ;;  %v272_v47 = vmul.f32 %v935_v27, %v264_v32  ;;  %v246_v8 = vld [vmem:[#allocation4 + $0x88] sm:$0xff] }
  0x5a   : > { %v206_v43 = vadd.f32 %v202_v35, %v185_v34  ;;  %v205_v50 = vmul.f32 %v201_v13, %v197_v40  ;;  %v222_v51 = vmul.f32 %v218_v15, %v214_v41  ;;  %v289_v55 = vmul.f32 %v937_v28, %v281_v33  ;;  %v280_v32 = vld [vmem:[#allocation4 + $0xc8] sm:$0xff] }
  0x5b   : > { %v225_v42 = vadd.f32 %v221_v22, %v208_v31  ;;  %v253_v57 = vmul.f32 %v933_v19, %v245_v39  ;;  %v239_v0 = vmul.f32 %v235_v17, %v231_v46  ;;  %v186_v1 = vmul.f32 %v184_v12, %v178_v52  ;;  %v282_v12 = vld [vmem:[#allocation4 + $0xd8] sm:$0xff] }
  0x5c   : > { %v223_v56 = vadd.f32 %v219_v36, %v206_v43  ;;  %v209_v63 = vadd.f32 %v205_v50, %v188_v45  ;;  %v203_v2 = vmul.f32 %v201_v13, %v195_v53  ;;  %v270_v5 = vmul.f32 %v935_v27, %v262_v49  ;;  %v263_v13 = vld [vmem:[#allocation4 + $0xa8] sm:$0xff]  ;;  %v299_v31 = vld [vmem:[#allocation4 + $0xf8] sm:$0xff] }
  0x5d   : > { %v242_v54 = vadd.f32 %v238_v26, %v225_v42  ;;  %v220_v7 = vmul.f32 %v218_v15, %v212_v59  ;;  %v256_v11 = vmul.f32 %v933_v19, %v248_v58  ;;  %v237_v16 = vmul.f32 %v235_v17, %v229_v60 }
  0x5e   : > { %v240_v4 = vadd.f32 %v236_v44, %v223_v56  ;;  %v226_v10 = vadd.f32 %v222_v51, %v209_v63  ;;  %v207_v14 = vadd.f32 %v203_v2, %v186_v1  ;;  %v306_v20 = vmul.f32 %v303_v48, %v298_v61 }
  0x5f   : > { %v259_v3 = vadd.f32 %v255_v38, %v242_v54  ;;  %v287_v22 = vmul.f32 %v937_v28, %v279_v62  ;;  %v273_v24 = vmul.f32 %v935_v27, %v265_v6  ;;  %v254_v15 = vmul.f32 %v933_v19, %v246_v8  ;;  %v297_v38 = vld [vmem:[#allocation4 + $0xe8] sm:$0xff] }
  0x60   : > { %v257_v21 = vadd.f32 %v253_v57, %v240_v4  ;;  %v243_v23 = vadd.f32 %v239_v0, %v226_v10  ;;  %v224_v25 = vadd.f32 %v220_v7, %v207_v14  ;;  %v304_v30 = vmul.f32 %v303_v48, %v296_v9 }
  0x61   : > { %v276_v18 = vadd.f32 %v272_v47, %v259_v3  ;;  %v290_v17 = vmul.f32 %v937_v28, %v282_v12  ;;  %v271_v35 = vmul.f32 %v935_v27, %v263_v13  ;;  %v307_v40 = vmul.f32 %v303_v48, %v299_v31 }
  0x62   : > { %v274_v29 = vadd.f32 %v270_v5, %v257_v21  ;;  %v260_v33 = vadd.f32 %v256_v11, %v243_v23  ;;  %v241_v34 = vadd.f32 %v237_v16, %v224_v25  ;;  %v288_v19 = vmul.f32 %v937_v28, %v280_v32 }
  0x63   : > { %v293_v26 = vadd.f32 %v289_v55, %v276_v18  ;;  %v305_v45 = vmul.f32 %v303_v48, %v297_v38 }
  0x64   : > { %v291_v37 = vadd.f32 %v287_v22, %v274_v29  ;;  %v277_v39 = vadd.f32 %v273_v24, %v260_v33  ;;  %v258_v41 = vadd.f32 %v254_v15, %v241_v34 }
  0x65   : > { %v950_v36 = vadd.f32 %v306_v20, %v293_v26 }
  0x66   : > { %v954_v42 = vadd.f32 %v304_v30, %v291_v37  ;;  %v294_v43 = vadd.f32 %v290_v17, %v277_v39  ;;  %v275_v44 = vadd.f32 %v271_v35, %v258_v41 }
  0x67   : > { %344 = vadd.xlane.f32.xlu1 %v950_v36 }
  0x68   : > { %312 = vadd.xlane.f32.xlu0 %v954_v42  ;;  %v957_v46 = vadd.f32 %v307_v40, %v294_v43  ;;  %v292_v27 = vadd.f32 %v288_v19, %v275_v44 }
  0x6a   : > { %v960_v47 = vadd.f32 %v305_v45, %v292_v27 }
  0x6b   : > { %346 = vadd.xlane.f32.xlu1 %v957_v46 }
  0x6c   : > { %314 = vadd.xlane.f32.xlu0 %v960_v47 }
  0xf4   : > { %v345_v49 = vpop.xlane.xlu1 %344 }
  0xf5   : > { %v313_v28 = vpop.xlane.xlu0 %312  ;;  %v348_v50 = vmul.f32 0.5, %v345_v49 }
  0xf6   : > { %v316_v52 = vmul.f32 0.5, %v313_v28 }
  0xf7   : > { %v350_v55 = vmul.f32 %v348_v50, %v348_v50 }
  0xf8   : > { %v347_v51 = vpop.xlane.xlu1 %346  ;;  %v318_v57 = vmul.f32 %v316_v52, %v316_v52 }
  0xf9   : > { %v349_v53 = vmul.f32 0.5, %v347_v51  ;;  %v315_v54 = vpop.xlane.xlu0 %314 }
  0xfa   : > { %v317_v56 = vmul.f32 0.5, %v315_v54 }
  0xfb   : > { %v351_v48 = vmul.f32 %v349_v53, %v349_v53 }
  0xfc   : > { %v319_v59 = vmul.f32 %v317_v56, %v317_v56 }
  0xfd   : > { %v352_v58 = vadd.f32 %v351_v48, %v350_v55 }
  0xfe   : > { %v320_v61 = vadd.f32 %v319_v59, %v318_v57 }
  0xff   : > { %v353_v60 = vrot.slane %v352_v58, 4 }
 0x100   : > { %v321_v63 = vrot.slane %v320_v61, 4 }
 0x101   : > { %v354_v62 = vadd.f32 %v353_v60, %v352_v58 }
 0x102   : > { %v322_v1 = vadd.f32 %v321_v63, %v320_v61 }
 0x103   : > { %v355_v0 = vrot.slane %v354_v62, 2 }
 0x104   : > { %v323_v3 = vrot.slane %v322_v1, 2 }
 0x105   : > { %v356_v2 = vadd.f32 %v355_v0, %v354_v62 }
 0x106   : > { %v324_v5 = vadd.f32 %v323_v3, %v322_v1 }
 0x107   : > { %v357_v4 = vrot.slane %v356_v2, 1 }
 0x108   : > { %v325_v7 = vrot.slane %v324_v5, 1 }
 0x109   : > { %v358_v6 = vadd.f32 %v357_v4, %v356_v2 }
 0x10a   : > { %v326_v10 = vadd.f32 %v325_v7, %v324_v5 }
 0x10b   : > { %v359_v8 = vadd.f32 1e-09, %v358_v6  ;;  %v362_v9 = vadd.f32 1.0, %v358_v6 }
 0x10c   : > { %v327_v11 = vadd.f32 1e-09, %v326_v10  ;;  %v330_v14 = vadd.f32 1.0, %v326_v10 }
 0x10d   : > { %659 = vrsqrt.f32 %v359_v8 }
 0x10e   : > { %661 = vrcp.f32 %v362_v9 }
 0x10f   : > { %663 = vrsqrt.f32 %v327_v11 }
 0x110   : > { %665 = vrcp.f32 %v330_v14 }
 0x117   : > { %v660_v16 = vpop.eup %659 }
 0x118   : > { %v662_v18 = vpop.eup %661  ;;  %v361_v20 = vmul.f32 %v660_v16, %v358_v6 }
 0x119   : > { %v664_v21 = vpop.eup %663 }
 0x11a   : > { %v364_v22 = vmul.f32 %v662_v18, %v361_v20  ;;  %v329_v12 = vmul.f32 %v664_v21, %v326_v10  ;;  %v666_v13 = vpop.eup %665 }
 0x11c   : > { %v365_v23 = vmul.f32 %v364_v22, %v348_v50  ;;  %v366_v24 = vmul.f32 %v364_v22, %v349_v53  ;;  %v332_v25 = vmul.f32 %v666_v13, %v329_v12 }
 0x11e   : > { %v367_v15 = vmul.f32 %v365_v23, %v950_v36  ;;  %v368_v26 = vmul.f32 %v366_v24, %v957_v46  ;;  %v333_v29 = vmul.f32 %v332_v25, %v316_v52  ;;  %v334_v30 = vmul.f32 %v332_v25, %v317_v56 }
 0x120   : > { %v369_v31 = vadd.f32 %v368_v26, %v367_v15  ;;  %v335_v32 = vmul.f32 %v333_v29, %v954_v42  ;;  %v336_v33 = vmul.f32 %v334_v30, %v960_v47 }
 0x122   : > { %v370_v17 = vrot.slane %v369_v31, 4  ;;  %v337_v34 = vadd.f32 %v336_v33, %v335_v32 }
 0x124   : > { %v371_v35 = vadd.f32 %v370_v17, %v369_v31  ;;  %v338_v37 = vrot.slane %v337_v34, 4 }
 0x126   : > { %v372_v38 = vrot.slane %v371_v35, 2  ;;  %v339_v39 = vadd.f32 %v338_v37, %v337_v34 }
 0x128   : > { %v373_v40 = vadd.f32 %v372_v38, %v371_v35  ;;  %v340_v41 = vrot.slane %v339_v39, 2 }
 0x12a   : > { %v374_v19 = vrot.slane %v373_v40, 1  ;;  %v341_v43 = vadd.f32 %v340_v41, %v339_v39 }
 0x12c   : > { %v967_v44 = vadd.f32 %v374_v19, %v373_v40  ;;  %v342_v45 = vrot.slane %v341_v43, 1 }
 0x12e   : > { %v969_v27 = vadd.f32 %v342_v45, %v341_v43 }
 0x130   : > { %v376_v49 = vmax.f32 %v969_v27, %v967_v44 }
 0x132   : > { %v380_v28 = vsub.f32 %v967_v44, %v376_v49  ;;  %v377_v50 = vsub.f32 %v969_v27, %v376_v49 }
 0x134   : > { %v381_v51 = vmul.f32 1.442695, %v380_v28  ;;  %v378_v52 = vmul.f32 1.442695, %v377_v50 }
 0x136   : > { %667 = vpow2.f32 %v381_v51 }
 0x137   : > { %669 = vpow2.f32 %v378_v52 }
 0x140   : > { %v668_v53 = vpop.eup %667 }
 0x141   : > { %v670_v54 = vpop.eup %669 }
 0x142   : > { %v383_v55 = vadd.f32 %v670_v54, %v668_v53 }
 0x144   : > { %671 = vrcp.f32 %v383_v55 }
 0x14e   : > { %v672_v48 = vpop.eup %671 }
 0x14f   : > { %v385_v56 = vmul.f32 %v672_v48, %v670_v54  ;;  %v386_v59 = vmul.f32 %v672_v48, %v668_v53 }
 0x151   : > { %v388_v57 = vmul.f32 %v385_v56, %v960_v47  ;;  %v387_v58 = vmul.f32 %v385_v56, %v954_v42  ;;  %v420_v60 = vmul.f32 %v386_v59, %v957_v46  ;;  %v419_v61 = vmul.f32 %v386_v59, %v950_v36 }
 0x153   : > { %391 = vadd.xlane.f32.xlu1 %v388_v57  ;;  %389 = vadd.xlane.f32.xlu0 %v387_v58 }
 0x157   : > { %423 = vadd.xlane.f32.xlu1 %v420_v60  ;;  %421 = vadd.xlane.f32.xlu0 %v419_v61 }
 0x1e0   : > { %v392_v62 = vpop.xlane.xlu1 %391  ;;  %v390_v63 = vpop.xlane.xlu0 %389 }
 0x1e1   : > { %v394_v0 = vmul.f32 %v392_v62, %v392_v62  ;;  %v393_v1 = vmul.f32 %v390_v63, %v390_v63 }
 0x1e3   : > { %v395_v2 = vadd.f32 %v394_v0, %v393_v1 }
 0x1e4   : > { %v424_v3 = vpop.xlane.xlu1 %423  ;;  %v422_v4 = vpop.xlane.xlu0 %421 }
 0x1e5   : > { %v396_v5 = vrot.slane %v395_v2, 4  ;;  %v426_v6 = vmul.f32 %v424_v3, %v424_v3  ;;  %v425_v7 = vmul.f32 %v422_v4, %v422_v4 }
 0x1e7   : > { %v397_v8 = vadd.f32 %v396_v5, %v395_v2  ;;  %v427_v9 = vadd.f32 %v426_v6, %v425_v7 }
 0x1e9   : > { %v398_v10 = vrot.slane %v397_v8, 2  ;;  %v428_v11 = vrot.slane %v427_v9, 4 }
 0x1eb   : > { %v399_v14 = vadd.f32 %v398_v10, %v397_v8  ;;  %v429_v16 = vadd.f32 %v428_v11, %v427_v9 }
 0x1ed   : > { %v400_v18 = vrot.slane %v399_v14, 1  ;;  %v430_v20 = vrot.slane %v429_v16, 2 }
 0x1ef   : > { %v401_v21 = vadd.f32 %v400_v18, %v399_v14  ;;  %v431_v22 = vadd.f32 %v430_v20, %v429_v16 }
 0x1f1   : > { %v402_v12 = vadd.f32 1e-09, %v401_v21  ;;  %v405_v13 = vadd.f32 1.0, %v401_v21  ;;  %v432_v23 = vrot.slane %v431_v22, 1 }
 0x1f3   : > { %673 = vrsqrt.f32 %v402_v12  ;;  %v433_v24 = vadd.f32 %v432_v23, %v431_v22 }
 0x1f4   : > { %675 = vrcp.f32 %v405_v13 }
 0x1f5   : > { %v434_v25 = vadd.f32 1e-09, %v433_v24  ;;  %v437_v15 = vadd.f32 1.0, %v433_v24 }
 0x1f7   : > { %677 = vrsqrt.f32 %v434_v25 }
 0x1f8   : > { %679 = vrcp.f32 %v437_v15 }
 0x1fd   : > { %v674_v26 = vpop.eup %673 }
 0x1fe   : > { %v404_v29 = vmul.f32 %v674_v26, %v401_v21  ;;  %v676_v30 = vpop.eup %675 }
 0x200   : > { %v407_v31 = vmul.f32 %v676_v30, %v404_v29 }
 0x201   : > { %v678_v32 = vpop.eup %677 }
 0x202   : > { %v408_v33 = vmul.f32 %v407_v31, %v390_v63  ;;  %v409_v17 = vmul.f32 %v407_v31, %v392_v62  ;;  %v436_v34 = vmul.f32 %v678_v32, %v433_v24  ;;  %v680_v35 = vpop.eup %679 }
 0x204   : > { %v410_v37 = vmul.f32 %v408_v33, %v954_v42  ;;  %v411_v38 = vmul.f32 %v409_v17, %v960_v47  ;;  %v439_v39 = vmul.f32 %v680_v35, %v436_v34 }
 0x206   : > { %v412_v40 = vadd.f32 %v411_v38, %v410_v37  ;;  %v440_v41 = vmul.f32 %v439_v39, %v422_v4  ;;  %v441_v19 = vmul.f32 %v439_v39, %v424_v3 }
 0x208   : > { %v413_v43 = vrot.slane %v412_v40, 4  ;;  %v442_v45 = vmul.f32 %v440_v41, %v950_v36  ;;  %v443_v49 = vmul.f32 %v441_v19, %v957_v46 }
 0x20a   : > { %v414_v28 = vadd.f32 %v413_v43, %v412_v40  ;;  %v444_v50 = vadd.f32 %v443_v49, %v442_v45 }
 0x20c   : > { %v415_v51 = vrot.slane %v414_v28, 2  ;;  %v445_v52 = vrot.slane %v444_v50, 4 }
 0x20e   : > { %v416_v53 = vadd.f32 %v415_v51, %v414_v28  ;;  %v446_v54 = vadd.f32 %v445_v52, %v444_v50 }
 0x210   : > { %v417_v55 = vrot.slane %v416_v53, 1  ;;  %v447_v48 = vrot.slane %v446_v54, 2 }
 0x212   : > { %v448_v56 = vadd.f32 %v447_v48, %v446_v54  ;;  %v418_v57 = vadd.f32 %v417_v55, %v416_v53 }
 0x214   : > { %v449_v58 = vrot.slane %v448_v56, 1  ;;  %v451_v60 = vadd.f32 %v418_v57, %v969_v27 }
 0x216   : > { %v450_v59 = vadd.f32 %v449_v58, %v448_v56 }
 0x218   : > { %v452_v61 = vadd.f32 %v450_v59, %v967_v44 }
 0x21a   : > { %v453_v62 = vmax.f32 %v451_v60, %v452_v61 }
 0x21c   : > { %v457_v63 = vsub.f32 %v452_v61, %v453_v62  ;;  %v454_v0 = vsub.f32 %v451_v60, %v453_v62 }
 0x21e   : > { %v458_v1 = vmul.f32 1.442695, %v457_v63  ;;  %v455_v2 = vmul.f32 1.442695, %v454_v0 }
 0x220   : > { %681 = vpow2.f32 %v458_v1 }
 0x221   : > { %683 = vpow2.f32 %v455_v2 }
 0x22a   : > { %v682_v3 = vpop.eup %681 }
 0x22b   : > { %v684_v4 = vpop.eup %683 }
 0x22c   : > { %v460_v5 = vadd.f32 %v684_v4, %v682_v3 }
 0x22e   : > { %685 = vrcp.f32 %v460_v5 }
 0x238   : > { %v686_v6 = vpop.eup %685 }
 0x239   : > { %v462_v7 = vmul.f32 %v686_v6, %v684_v4  ;;  %v463_v27 = vmul.f32 %v686_v6, %v682_v3 }
 0x23b   : > { %v465_v8 = vmul.f32 %v462_v7, %v960_v47  ;;  %v464_v9 = vmul.f32 %v462_v7, %v954_v42  ;;  %v491_v44 = vmul.f32 %v463_v27, %v957_v46  ;;  %v490_v10 = vmul.f32 %v463_v27, %v950_v36 }
 0x23d   : > { %468 = vadd.xlane.f32.xlu1 %v465_v8  ;;  %466 = vadd.xlane.f32.xlu0 %v464_v9 }
 0x241   : > { %494 = vadd.xlane.f32.xlu1 %v491_v44  ;;  %492 = vadd.xlane.f32.xlu0 %v490_v10 }
 0x2ca   : > { %v469_v11 = vpop.xlane.xlu1 %468  ;;  %v467_v14 = vpop.xlane.xlu0 %466 }
 0x2cb   : > { %v471_v16 = vmul.f32 %v469_v11, %v469_v11  ;;  %v470_v18 = vmul.f32 %v467_v14, %v467_v14 }
 0x2cd   : > { %v472_v20 = vadd.f32 %v471_v16, %v470_v18 }
 0x2ce   : > { %v495_v21 = vpop.xlane.xlu1 %494  ;;  %v493_v22 = vpop.xlane.xlu0 %492 }
 0x2cf   : > { %v473_v12 = vrot.slane %v472_v20, 4  ;;  %v497_v47 = vmul.f32 %v495_v21, %v495_v21  ;;  %v496_v13 = vmul.f32 %v493_v22, %v493_v22 }
 0x2d1   : > { %v474_v42 = vadd.f32 %v473_v12, %v472_v20  ;;  %v498_v23 = vadd.f32 %v497_v47, %v496_v13 }
 0x2d3   : > { %v475_v24 = vrot.slane %v474_v42, 2  ;;  %v499_v25 = vrot.slane %v498_v23, 4 }
 0x2d5   : > { %v476_v46 = vadd.f32 %v475_v24, %v474_v42  ;;  %v500_v15 = vadd.f32 %v499_v25, %v498_v23 }
 0x2d7   : > { %v477_v36 = vrot.slane %v476_v46, 1  ;;  %v501_v26 = vrot.slane %v500_v15, 2 }
 0x2d9   : > { %v478_v29 = vadd.f32 %v477_v36, %v476_v46  ;;  %v502_v30 = vadd.f32 %v501_v26, %v500_v15 }
 0x2db   : > { %v479_v31 = vadd.f32 1e-09, %v478_v29  ;;  %v482_v32 = vadd.f32 1.0, %v478_v29  ;;  %v503_v33 = vrot.slane %v502_v30, 1 }
 0x2dd   : > { %687 = vrsqrt.f32 %v479_v31  ;;  %v504_v17 = vadd.f32 %v503_v33, %v502_v30 }
 0x2de   : > { %689 = vrcp.f32 %v482_v32 }
 0x2df   : > { %v505_v34 = vadd.f32 1e-09, %v504_v17  ;;  %v508_v35 = vadd.f32 1.0, %v504_v17 }
 0x2e1   : > { %691 = vrsqrt.f32 %v505_v34 }
 0x2e2   : > { %693 = vrcp.f32 %v508_v35 }
 0x2e7   : > { %v688_v37 = vpop.eup %687 }
 0x2e8   : > { %v481_v38 = vmul.f32 %v688_v37, %v478_v29  ;;  %v690_v39 = vpop.eup %689 }
 0x2ea   : > { %v484_v40 = vmul.f32 %v690_v39, %v481_v38 }
 0x2eb   : > { %v692_v41 = vpop.eup %691 }
 0x2ec   : > { %v485_v19 = vmul.f32 %v484_v40, %v467_v14  ;;  %v486_v43 = vmul.f32 %v484_v40, %v469_v11  ;;  %v507_v45 = vmul.f32 %v692_v41, %v504_v17  ;;  %v694_v49 = vpop.eup %693 }
 0x2ee   : > { %488 = vst.msk [vmem:[%s175_s22] sm:$0xff] %vm487_vm0, %v485_v19  ;;  %489 = vst.msk [vmem:[%s175_s22 + $0x8] sm:$0xff] %vm487_vm0, %v486_v43  ;;  %v510_v28 = vmul.f32 %v694_v49, %v507_v45 }
 0x2f0   : > { %v511_v50 = vmul.f32 %v510_v28, %v493_v22  ;;  %v512_v51 = vmul.f32 %v510_v28, %v495_v21 }
 0x2f2   : > { %514 = vst.msk [vmem:[%s175_s22] sm:$0xff] %vm513_vm1, %v511_v50  ;;  %515 = vst.msk [vmem:[%s175_s22 + $0x8] sm:$0xff] %vm513_vm1, %v512_v51 }
 0x2f3 PF: > { %p13_p8 = scmp.ge.s32.totalorder %s856_s19, 4   ;;  %s1021_s9 = smov %s783_s10 }
 0x2f4   : > { %s1022_s10 = smov %s787_s11  ;;  %s1023_s11 = smov %s882_s6 }
 0x2f5   : > { %s1024_s12 = smov %s856_s19  ;;  %15 = sbr.rel (!%p13_p8) target bundleno = 4 (0x4), region = 79 }
 0x2fc   :  { %537 = vsyncpa [#allocation3], 1 }
 0x2fd   :  { %539 = vsyncpa [#allocation3 + $0x1], 1 }
 0x2fe   :  { %540 = vsyncpa [#allocation5], 1 }

</bundles_post_ra>
